<compile_context>
chip_gen: v5e
topology: v5e:2x2
jax: 0.10.0
libtpu: 0.0.40
codegen_flags: <defaults>
</compile_context>

<pallas_src>
import functools
import math

import jax
import jax.numpy as jnp
from jax import lax
from jax.experimental import pallas as pl
from jax.experimental.pallas import tpu as pltpu


_NEG_BIG = -1e30  # finite "-inf": exp(_NEG_BIG - shift) == 0, no Inf/NaN paths


# --------------------------------------------------------------------------- #
# Pass 1: normalize rows (optional) + fold the softmax scale into the embeds.
# --------------------------------------------------------------------------- #
def _prep_kernel(x_ref, *out_refs, scale, normalize_embeds):
    x = x_ref[...].astype(jnp.float32)
    if normalize_embeds:
        (z_ref,) = out_refs
        nrm2 = jnp.sum(x * x, axis=1, keepdims=True)
        # F.normalize: x / max(||x||, 1e-12) == x * rsqrt(max(||x||^2, 1e-24))
        inv = lax.rsqrt(jnp.maximum(nrm2, 1e-24))
        z = x * (inv * math.sqrt(2.0 * scale))     # gram tile == (shifted) logits
        z_ref[...] = z.astype(z_ref.dtype)
    else:
        z_ref, sq_ref = out_refs
        z = x * math.sqrt(2.0 * scale)             # logits = gram - sq_i - sq_j
        zq = z.astype(z_ref.dtype)                 # quantize first so sq matches
        z_ref[...] = zq
        zf = zq.astype(jnp.float32)
        sq_ref[...] = 0.5 * jnp.sum(zf * zf, axis=1, keepdims=True)


# --------------------------------------------------------------------------- #
# Pass 2: tiled NCA with static-shift or online softmax.
# --------------------------------------------------------------------------- #
def _nca_tile_kernel(*refs, n_valid, tq, tk, normalize_embeds, static_shift,
                     padded):
    if normalize_embeds:
        zq_ref, zkt_ref, labq_ref, labk_ref, logp_ref, cnt_ref, *scr = refs
        sqq_ref = sqk_ref = None
    else:
        (zq_ref, zkt_ref, sqq_ref, sqk_ref, labq_ref, labk_ref,
         logp_ref, cnt_ref, *scr) = refs
    if static_shift is None:
        m_scr, den_scr, num_scr = scr
    else:
        den_scr, num_scr = scr

    qi = pl.program_id(0)
    ki = pl.program_id(1)

    @pl.when(ki == 0)
    def _init():
        den_scr[...] = jnp.zeros_like(den_scr)
        num_scr[...] = jnp.zeros_like(num_scr)
        if static_shift is None:
            m_scr[...] = jnp.full_like(m_scr, _NEG_BIG)

    # Gram tile on the MXU, natively laid out (Tq, D) @ (D, Tk), f32 accumulate.
    g = jnp.dot(zq_ref[...], zkt_ref[...], preferred_element_type=jnp.float32)

    if normalize_embeds:
        # Unit rows with sqrt(2*scale) folded: -scale*d^2 = g - 2*scale.
        logits = g
    else:
        # sqrt(2*scale) folded, sq pre-halved: -scale*d^2 = g - sq_i - sq_j <= 0.
        logits = jnp.minimum(g - sqq_ref[...] - sqk_ref[...], 0.0)

    # Diagonal / padding mask from in-kernel iota (no streamed index operands).
    rows = qi * tq + lax.broadcasted_iota(jnp.int32, (tq, tk), 0)
    cols = ki * tk + lax.broadcasted_iota(jnp.int32, (tq, tk), 1)
    invalid = rows == cols
    if padded:
        invalid = invalid | (cols >= n_valid)
    logits = jnp.where(invalid, _NEG_BIG, logits)

    pos = labq_ref[...] == labk_ref[...]

    if static_shift is None:
        # Online softmax (un-normalized path, or very large scale).
        m_prev = m_scr[...]
        m_new = jnp.maximum(m_prev, jnp.max(logits, axis=1, keepdims=True))
        corr = jnp.exp(m_prev - m_new)
        p = jnp.exp(logits - m_new)                                  # (Tq, Tk)
        den_scr[...] = corr * den_scr[...] + jnp.sum(p, axis=1, keepdims=True)
        num_scr[...] = corr * num_scr[...] + jnp.sum(
            jnp.where(pos, p, 0.0), axis=1, keepdims=True)
        m_scr[...] = m_new
    else:
        # Static shift: logits <= 2*scale (+ bf16 slack), so exp never overflows
        # and masked entries (_NEG_BIG) contribute exactly 0.
        p = jnp.exp(logits - static_shift)                           # (Tq, Tk)
        den_scr[...] = den_scr[...] + jnp.sum(p, axis=1, keepdims=True)
        num_scr[...] = num_scr[...] + jnp.sum(
            jnp.where(pos, p, 0.0), axis=1, keepdims=True)

    @pl.when(ki == pl.num_programs(1) - 1)
    def _finalize():
        num = num_scr[...]
        nz = num > 0.0
        # log(prob) = log(num) - log(den); rows with zero positive mass are
        # excluded from the mean (matches `prob[prob != 0]` in the reference).
        logp_ref[...] = jnp.where(nz, jnp.log(num) - jnp.log(den_scr[...]), 0.0)
        cnt_ref[...] = nz.astype(jnp.float32)


# --------------------------------------------------------------------------- #
# Wrapper
# --------------------------------------------------------------------------- #
def _choose_tiles(n):
    """Decoupled row/col tiles: big resident Tq, 256-wide streamed Tk."""
    nmin = max(128, ((n + 127) // 128) * 128)
    tk = 256 if nmin >= 256 else 128
    tq = max(tk, min(512, (nmin // tk) * tk))
    n_pad = ((n + tq - 1) // tq) * tq
    # v7x has 2 TensorCores sharding the parallel axis: keep >=2 row blocks
    # whenever the problem is big enough.
    if n_pad // tq < 2 and n_pad // tk >= 2:
        tq = max(tk, (n_pad // 2 // tk) * tk)
    return tq, tk, n_pad


def nca_loss(embeds, labels, *, scale=32, normalize_embeds=True,
             gram_dtype=jnp.bfloat16):
    """Pallas NCA loss. embeds: (N, D) float, labels: (N,) int. Returns scalar."""
    n, d = embeds.shape
    tq, tk, n_pad = _choose_tiles(n)
    d_pad = ((d + 127) // 128) * 128

    x = jnp.pad(embeds, ((0, n_pad - n), (0, d_pad - d)))
    lab = jnp.pad(labels.astype(jnp.int32), (0, n_pad - n))

    # ---- pass 1: normalize + fold scale (Pallas) ----------------------------
    if normalize_embeds:
        prep_out_shape = (jax.ShapeDtypeStruct((n_pad, d_pad), gram_dtype),)
        prep_out_specs = (pl.BlockSpec((tq, d_pad), lambda i: (i, 0)),)
    else:
        prep_out_shape = (jax.ShapeDtypeStruct((n_pad, d_pad), gram_dtype),
                          jax.ShapeDtypeStruct((n_pad, 1), jnp.float32))
        prep_out_specs = (pl.BlockSpec((tq, d_pad), lambda i: (i, 0)),
                          pl.BlockSpec((tq, 1), lambda i: (i, 0)))
    prep = functools.partial(_prep_kernel, scale=float(scale),
                             normalize_embeds=normalize_embeds)
    prep_out = pl.pallas_call(
        prep,
        out_shape=prep_out_shape,
        grid_spec=pltpu.PrefetchScalarGridSpec(
            num_scalar_prefetch=0,
            grid=(n_pad // tq,),
            in_specs=[pl.BlockSpec((tq, d_pad), lambda i: (i, 0))],
            out_specs=prep_out_specs),
        compiler_params=pltpu.CompilerParams(dimension_semantics=("parallel",)),
    )(x)

    if normalize_embeds:
        (z,) = prep_out
        sq = None
    else:
        z, sq = prep_out

    # One-time layout plumbing (XLA) so the Gram matmul is MXU-native (Tq,D)@(D,Tk).
    z_t = z.T
    lab_col = lab.reshape(n_pad, 1)
    lab_row = lab.reshape(1, n_pad)

    # Static softmax shift for the normalized path with moderate scale.
    static_shift = None
    if normalize_embeds and 2.0 * float(scale) <= 80.0:
        static_shift = 2.0 * float(scale)

    operands = [z, z_t]
    in_specs = [pl.BlockSpec((tq, d_pad), lambda qi, ki: (qi, 0)),   # z rows
                pl.BlockSpec((d_pad, tk), lambda qi, ki: (0, ki))]   # z cols (pre-T)
    if not normalize_embeds:
        operands += [sq, sq.reshape(1, n_pad)]
        in_specs += [pl.BlockSpec((tq, 1), lambda qi, ki: (qi, 0)),  # 0.5|z|^2 rows
                     pl.BlockSpec((1, tk), lambda qi, ki: (0, ki))]  # 0.5|z|^2 cols
    operands += [lab_col, lab_row]
    in_specs += [pl.BlockSpec((tq, 1), lambda qi, ki: (qi, 0)),      # labels rows
                 pl.BlockSpec((1, tk), lambda qi, ki: (0, ki))]      # labels cols

    scratch = []
    if static_shift is None:
        scratch.append(pltpu.VMEM((tq, 1), jnp.float32))             # running max
    scratch += [pltpu.VMEM((tq, 1), jnp.float32),                    # denominator
                pltpu.VMEM((tq, 1), jnp.float32)]                    # positive mass

    # Explicit VMEM budget for the enlarged tiles (double-buffered matmul
    # operands + f32 (Tq,Tk) temporaries), clamped to fit v7x's 64 MiB VMEM.
    z_bytes = jnp.dtype(gram_dtype).itemsize
    vmem_est = ((2 * tq * d_pad + 2 * d_pad * tk) * z_bytes
                + 16 * tq * tk + (1 << 20))
    vmem_limit = int(min(max(2 * vmem_est, 32 * 1024 * 1024), 48 * 1024 * 1024))

    kernel = functools.partial(_nca_tile_kernel, n_valid=n, tq=tq, tk=tk,
                               normalize_embeds=normalize_embeds,
                               static_shift=static_shift,
                               padded=(n_pad != n))
    nq, nk = n_pad // tq, n_pad // tk
    logp, cnt = pl.pallas_call(
        kernel,
        out_shape=(jax.ShapeDtypeStruct((n_pad, 1), jnp.float32),
                   jax.ShapeDtypeStruct((n_pad, 1), jnp.float32)),
        grid_spec=pltpu.PrefetchScalarGridSpec(
            num_scalar_prefetch=0,
            grid=(nq, nk),
            in_specs=in_specs,
            out_specs=(pl.BlockSpec((tq, 1), lambda qi, ki: (qi, 0)),
                       pl.BlockSpec((tq, 1), lambda qi, ki: (qi, 0))),
            scratch_shapes=scratch),
        compiler_params=pltpu.CompilerParams(
            dimension_semantics=("parallel", "arbitrary"),
            vmem_limit_bytes=vmem_limit),
    )(*operands)

    # Final O(N) scalar reduction (layout plumbing, negligible cost).
    logp = logp[:n, 0]
    cnt = cnt[:n, 0]
    return -jnp.sum(logp) / jnp.sum(cnt)


# --------------------------------------------------------------------------- #
# Pure-JAX reference (gram_dtype mimics the kernel's Gram-operand precision;
# gram_dtype=float32 is the exact PyTorch-spec computation).
# --------------------------------------------------------------------------- #
def _nca_loss_ref(embeds, labels, *, scale=32, normalize_embeds=True,
                  gram_dtype=jnp.float32):
    x = embeds.astype(jnp.float32)
    if normalize_embeds:
        nrm = jnp.sqrt(jnp.sum(x * x, axis=1, keepdims=True))
        x = x / jnp.maximum(nrm, 1e-12)
    z = (x * math.sqrt(2.0 * scale)).astype(gram_dtype).astype(jnp.float32)
    g = jnp.dot(z, z.T, preferred_element_type=jnp.float32)
    if normalize_embeds:
        logits = g                                  # softmax-equiv to -scale*d^2
    else:
        sq = 0.5 * jnp.sum(z * z, axis=1)
        logits = jnp.minimum(g - sq[:, None] - sq[None, :], 0.0)
    m = x.shape[0]
    logits = jnp.where(jnp.eye(m, dtype=bool), -jnp.inf, logits)
    pos_mask = (labels[:, None] == labels[None, :]).astype(jnp.float32)
    prob = jax.nn.softmax(logits, axis=1)
    prob = jnp.sum(prob * pos_mask, axis=1)
    nz = prob > 0
    return -jnp.sum(jnp.where(nz, jnp.log(prob), 0.0)) / jnp.sum(nz)


if __name__ == "__main__":
    key = jax.random.PRNGKey(0)
    k1, k2, k3, k4 = jax.random.split(key, 4)

    # 1) Small metric-learning batch: 48 embeddings of dim 32, 4 classes.
    N, D = 48, 32
    embeds = jax.random.normal(k1, (N, D), dtype=jnp.float32)
    labels = jax.random.randint(k2, (N,), 0, 4, dtype=jnp.int32)

    # Default path (normalized, bf16 Gram operands, static-shift softmax).
    loss = nca_loss(embeds, labels, scale=32, normalize_embeds=True)
    jax.block_until_ready(loss)
    ref_bf16 = _nca_loss_ref(embeds, labels, scale=32, normalize_embeds=True,
                             gram_dtype=jnp.bfloat16)
    ref_f32 = _nca_loss_ref(embeds, labels, scale=32, normalize_embeds=True)
    assert jnp.allclose(loss, ref_bf16, atol=2e-3, rtol=2e-3), (loss, ref_bf16)
    assert jnp.allclose(loss, ref_f32, atol=5e-2, rtol=5e-2), (loss, ref_f32)

    # f32 Gram path: tight tolerance against the exact-precision reference.
    loss32 = nca_loss(embeds, labels, scale=32, normalize_embeds=True,
                      gram_dtype=jnp.float32)
    jax.block_until_ready(loss32)
    assert jnp.allclose(loss32, ref_f32, atol=1e-4, rtol=1e-4), (loss32, ref_f32)

    # 2) Un-normalized path (online softmax), f32 Gram.
    emb_u = 0.3 * embeds
    loss_u = nca_loss(emb_u, labels, scale=4, normalize_embeds=False,
                      gram_dtype=jnp.float32)
    jax.block_until_ready(loss_u)
    ref_u = _nca_loss_ref(emb_u, labels, scale=4, normalize_embeds=False)
    assert jnp.allclose(loss_u, ref_u, atol=1e-4, rtol=1e-4), (loss_u, ref_u)

    # 3) Multi-block grid with decoupled tiles (Tq=512, Tk=256) and padding.
    N2, D2 = 700, 40
    embeds2 = jax.random.normal(k3, (N2, D2), dtype=jnp.float32)
    labels2 = jax.random.randint(k4, (N2,), 0, 16, dtype=jnp.int32)
    loss2 = nca_loss(embeds2, labels2, scale=32, normalize_embeds=True)
    jax.block_until_ready(loss2)
    ref2 = _nca_loss_ref(embeds2, labels2, scale=32, normalize_embeds=True,
                         gram_dtype=jnp.bfloat16)
    assert jnp.allclose(loss2, ref2, atol=2e-3, rtol=2e-3), (loss2, ref2)

    print("KERNEL_OK")
</pallas_src>

<mosaic_0001>
module attributes {stable_mosaic.version = 11 : i64} {
  func.func @_prep_kernel(%arg0: i32, %arg1: memref<128x128xf32, #tpu.memory_space<vmem>>, %arg2: memref<128x128xbf16, #tpu.memory_space<vmem>>) attributes {dimension_semantics = [#tpu.dimension_semantics<parallel>], iteration_bounds = array<i64: 1>, scalar_prefetch = 0 : i64, scratch_operands = 0 : i64, tpu.core_type = #tpu.core_type<tc>, window_params = [{transform_indices = @transform_0, window_bounds = array<i64: 128, 128>}, {transform_indices = @transform_1, window_bounds = array<i64: 128, 128>}]} {
    %c0 = arith.constant 0 : index
    %c0_0 = arith.constant 0 : index
    %0 = vector.load %arg1[%c0, %c0_0] : memref<128x128xf32, #tpu.memory_space<vmem>>, vector<128x128xf32>
    %1 = arith.mulf %0, %0 : vector<128x128xf32>
    %cst = arith.constant dense<0.000000e+00> : vector<128xf32>
    %2 = vector.multi_reduction <add>, %1, %cst [1] : vector<128x128xf32> to vector<128xf32>
    %3 = vector.shape_cast %2 : vector<128xf32> to vector<128x1xf32>
    %cst_1 = arith.constant 1.000000e-24 : f32
    %4 = vector.broadcast %cst_1 : f32 to vector<128x1xf32>
    %5 = arith.maximumf %3, %4 : vector<128x1xf32>
    %6 = math.rsqrt %5 : vector<128x1xf32>
    %cst_2 = arith.constant 8.000000e+00 : f32
    %7 = vector.broadcast %cst_2 : f32 to vector<128x1xf32>
    %8 = arith.mulf %6, %7 : vector<128x1xf32>
    %9 = vector.broadcast %8 : vector<128x1xf32> to vector<128x128xf32>
    %10 = arith.mulf %0, %9 : vector<128x128xf32>
    %11 = arith.truncf %10 : vector<128x128xf32> to vector<128x128xbf16>
    %c0_3 = arith.constant 0 : index
    %c0_4 = arith.constant 0 : index
    %12 = vector.load %arg2[%c0_3, %c0_4] : memref<128x128xbf16, #tpu.memory_space<vmem>>, vector<128x128xbf16>
    tpu.vector_store %arg2[%c0_3, %c0_4], %11 {strides = array<i32>} : memref<128x128xbf16, #tpu.memory_space<vmem>>, vector<128x128xbf16>,
    return
  }
  func.func @transform_0(%arg0: i32) -> (i32, i32) {
    %c0_i32 = arith.constant 0 : i32
    %c0_i32_0 = arith.constant 0 : i32
    return %arg0, %c0_i32 : i32, i32
  }
  func.func @transform_1(%arg0: i32) -> (i32, i32) {
    %c0_i32 = arith.constant 0 : i32
    %c0_i32_0 = arith.constant 0 : i32
    return %arg0, %c0_i32 : i32, i32
  }
}

</mosaic_0001>

<bundles_post_ra>
// kernel: tpu_custom_call.1
= control target key start
LH: loop header
LB: loop body
LE: loop exit
PB: predicated region body
PF: predicated region fallthrough
CT: control target
= control target key end

     0   :  { %6 = vsyncpa [#allocation3], 0  ;;  %s759_s0 = inlined_call_operand.hbm [shape: f32[128,128], index: 0, kind: input, shape index: {}]   ;;  %s760_s1 = inlined_call_operand.hbm [shape: bf16[128,128], index: 1, kind: output, shape index: {}]  }
   0x1   :  { %7 = vsyncpa [#allocation4], 0  ;;  %s12_s8 = sshll.u32 %s759_s0, 4  ;;  %s485_s9 = smov [#allocation2]   ;;  %s13_s8 = int_to_ptr.hbm [resolvable:$true] %s12_s8 }
   0x2   :  { %s14_s10 = sshll.u32 %s485_s9, 4  ;;  %s486_s11 = smov 128   ;;  %s15_s10 = int_to_ptr.vmem [resolvable:$true] %s14_s10 }
   0x3   :  { %s487_s12 = smov 8  }
   0x4   :  { %20 = dma.hbm_to_vmem [thread:$0]  %s13_s8, 2048, %s15_s10, [#allocation3], %s486_s11, %s486_s11, %s487_s12  }
   0x5   :  { %481 = dma.done.wait [#allocation3], 2048  }
   0x6   :  { %482 = vsyncadd [#allocation3], 4294965248  ;;  %v504_v0 = vld [vmem:[#allocation2 + $0x20] sm:$0xff]  ;;  %v506_v1 = vld [vmem:[#allocation2 + $0x10] sm:$0xff]  ;;  %s488_s0 = smov [#allocation5]   ;;  %s335_s16 = sshll.u32 %s760_s1, 4  ;;  %s336_s16 = int_to_ptr.hbm [resolvable:$true] %s335_s16 }
   0x7   :  { %v508_v2 = vld [vmem:[#allocation2] sm:$0xff]  ;;  %v45_v3 = vmul.f32 %v504_v0, %v504_v0  ;;  %v43_v4 = vmul.f32 %v506_v1, %v506_v1  ;;  %v516_v6 = vld [vmem:[#allocation2 + $0x28] sm:$0xff]  ;;  %v518_v7 = vld [vmem:[#allocation2 + $0x18] sm:$0xff]  ;;  %s333_s13 = sshll.u32 %s488_s0, 4  ;;  %s489_s17 = smov 64   ;;  %s334_s13 = int_to_ptr.vmem [resolvable:$true] %s333_s13 }
   0x8   :  { %v41_v5 = vmul.f32 %v508_v2, %v508_v2  ;;  %v520_v8 = vld [vmem:[#allocation2 + $0x8] sm:$0xff]  ;;  %v46_v9 = vmul.f32 %v516_v6, %v516_v6  ;;  %v44_v10 = vmul.f32 %v518_v7, %v518_v7  ;;  %v528_v12 = vld [vmem:[#allocation2 + $0x40] sm:$0xff]  ;;  %v530_v13 = vld [vmem:[#allocation2 + $0x38] sm:$0xff]  ;;  %s490_s18 = smov 4  }
   0x9   :  { %65 = vadd.xlane.f32.xlu2 %v45_v3  ;;  %61 = vadd.xlane.f32.xlu1 %v43_v4  ;;  %v42_v11 = vmul.f32 %v520_v8, %v520_v8  ;;  %v532_v14 = vld [vmem:[#allocation2 + $0x30] sm:$0xff]  ;;  %v49_v15 = vmul.f32 %v528_v12, %v528_v12  ;;  %v48_v16 = vmul.f32 %v530_v13, %v530_v13  ;;  %v540_v18 = vld [vmem:[#allocation2 + $0x58] sm:$0xff]  ;;  %v544_v20 = vld [vmem:[#allocation2 + $0x48] sm:$0xff] }
   0xa   :  { %57 = vadd.xlane.f32.xlu0 %v41_v5  ;;  %v47_v17 = vmul.f32 %v532_v14, %v532_v14  ;;  %v542_v19 = vld [vmem:[#allocation2 + $0x50] sm:$0xff]  ;;  %v52_v21 = vmul.f32 %v540_v18, %v540_v18  ;;  %v50_v23 = vmul.f32 %v544_v20, %v544_v20  ;;  %v554_v25 = vld [vmem:[#allocation2 + $0x68] sm:$0xff]  ;;  %v556_v26 = vld [vmem:[#allocation2 + $0x60] sm:$0xff] }
   0xb   :  { %v51_v22 = vmul.f32 %v542_v19, %v542_v19  ;;  %v552_v24 = vld [vmem:[#allocation2 + $0x70] sm:$0xff]  ;;  %v54_v28 = vmul.f32 %v554_v25, %v554_v25  ;;  %v53_v29 = vmul.f32 %v556_v26, %v556_v26  ;;  %v564_v30 = vld [vmem:[#allocation2 + $0x78] sm:$0xff] }
   0xc   :  { %v55_v27 = vmul.f32 %v552_v24, %v552_v24  ;;  %v56_v31 = vmul.f32 %v564_v30, %v564_v30 }
  0x11   :  { %67 = vadd.xlane.f32.xlu2 %v46_v9  ;;  %63 = vadd.xlane.f32.xlu1 %v44_v10 }
  0x12   :  { %59 = vadd.xlane.f32.xlu0 %v42_v11 }
  0x19   :  { %73 = vadd.xlane.f32.xlu2 %v49_v15  ;;  %71 = vadd.xlane.f32.xlu1 %v48_v16 }
  0x1a   :  { %69 = vadd.xlane.f32.xlu0 %v47_v17 }
  0x21   :  { %79 = vadd.xlane.f32.xlu2 %v52_v21  ;;  %77 = vadd.xlane.f32.xlu1 %v51_v22 }
  0x22   :  { %75 = vadd.xlane.f32.xlu0 %v50_v23 }
  0x29   :  { %85 = vadd.xlane.f32.xlu2 %v55_v27  ;;  %83 = vadd.xlane.f32.xlu1 %v54_v28 }
  0x2a   :  { %81 = vadd.xlane.f32.xlu0 %v53_v29 }
  0x32   :  { %87 = vadd.xlane.f32.xlu0 %v56_v31 }
  0x7c   :  { %v66_v32 = vpop.xlane.xlu2 %65  ;;  %v62_v33 = vpop.xlane.xlu1 %61 }
  0x7d   :  { %v93_v34 = vmax.f32 %v66_v32, 1e-24  ;;  %v91_v35 = vmax.f32 %v62_v33, 1e-24  ;;  %v58_v36 = vpop.xlane.xlu0 %57 }
  0x7e   :  { %v568_v37 = vmax.f32 %v58_v36, 1e-24 }
  0x7f   :  { %401 = vrsqrt.f32 %v93_v34  ;;  %vm151_vm0 = vweird.f32 %v93_v34  ;;  %vm131_vm1 = vweird.f32 %v91_v35 }
  0x80   :  { %403 = vrsqrt.f32 %v91_v35  ;;  %vm111_vm4 = vweird.f32 %v568_v37 }
  0x81   :  { %405 = vrsqrt.f32 %v568_v37 }
  0x84   :  { %v68_v38 = vpop.xlane.xlu2 %67  ;;  %v64_v39 = vpop.xlane.xlu1 %63 }
  0x85   :  { %v402_v40 = vpop.eup %401  ;;  %v571_v41 = vmax.f32 %v68_v38, 1e-24  ;;  %v573_v42 = vmax.f32 %v64_v39, 1e-24  ;;  %v60_v43 = vpop.xlane.xlu0 %59 }
  0x86   :  { %v575_v44 = vpop.eup %403  ;;  %v146_v45 = vmul.f32 %v402_v40, %v93_v34  ;;  %v577_v46 = vmax.f32 %v60_v43, 1e-24  ;;  %vm152_vm2 = vweird.f32 %v402_v40 }
  0x87   :  { %v579_v47 = vpop.eup %405  ;;  %v126_v48 = vmul.f32 %v575_v44, %v91_v35  ;;  %407 = vrsqrt.f32 %v571_v41  ;;  %vm132_vm3 = vweird.f32 %v575_v44  ;;  %vm601_vm5 = vmor %vm151_vm0, %vm152_vm2  ;;  %vm161_vm7 = vweird.f32 %v571_v41 }
  0x88   :  { %v147_v49 = vmul.f32 %v402_v40, %v146_v45  ;;  %v106_v50 = vmul.f32 %v579_v47, %v568_v37  ;;  %409 = vrsqrt.f32 %v573_v42  ;;  %vm112_vm6 = vweird.f32 %v579_v47  ;;  %vm614_vm9 = vmor %vm131_vm1, %vm132_vm3 }
  0x89   :  { %v127_v51 = vmul.f32 %v575_v44, %v126_v48  ;;  %411 = vrsqrt.f32 %v577_v46  ;;  %vm141_vm8 = vweird.f32 %v573_v42  ;;  %vm121_vm12 = vweird.f32 %v577_v46  ;;  %vm629_vm13 = vmor %vm111_vm4, %vm112_vm6 }
  0x8a   :  { %v148_v52 = vmul.f32 0.5, %v147_v49  ;;  %v107_v53 = vmul.f32 %v579_v47, %v106_v50 }
  0x8b   :  { %v128_v54 = vmul.f32 0.5, %v127_v51 }
  0x8c   :  { %v149_v55 = vsub.f32 1.5, %v148_v52  ;;  %v108_v56 = vmul.f32 0.5, %v107_v53  ;;  %v74_v57 = vpop.xlane.xlu2 %73  ;;  %v72_v58 = vpop.xlane.xlu1 %71 }
  0x8d   :  { %v408_v59 = vpop.eup %407  ;;  %v129_v60 = vsub.f32 1.5, %v128_v54  ;;  %v589_v61 = vmax.f32 %v74_v57, 1e-24  ;;  %v70_v62 = vpop.xlane.xlu0 %69  ;;  %v598_v17 = vmax.f32 %v72_v58, 1e-24 }
  0x8e   :  { %v410_v63 = vpop.eup %409  ;;  %v150_v3 = vmul.f32 %v402_v40, %v149_v55  ;;  %v109_v4 = vsub.f32 1.5, %v108_v56  ;;  %v156_v5 = vmul.f32 %v408_v59, %v571_v41  ;;  %vm162_vm10 = vweird.f32 %v408_v59 }
  0x8f   :  { %v412_v9 = vpop.eup %411  ;;  %v136_v10 = vmul.f32 %v410_v63, %v573_v42  ;;  %413 = vrsqrt.f32 %v589_v61  ;;  %v130_v11 = vmul.f32 %v575_v44, %v129_v60  ;;  %vm142_vm11 = vweird.f32 %v410_v63  ;;  %vm163_vm15 = vmor %vm161_vm7, %vm162_vm10 }
  0x90   :  { %v157_v15 = vmul.f32 %v408_v59, %v156_v5  ;;  %v116_v16 = vmul.f32 %v412_v9, %v577_v46  ;;  %v154_v23 = vsel %vm601_vm5, %v402_v40, %v150_v3  ;;  %v110_v27 = vmul.f32 %v579_v47, %v109_v4  ;;  %vm143_vm0 = vmor %vm141_vm8, %vm142_vm11 }
  0x91   :  { %v137_v22 = vmul.f32 %v410_v63, %v136_v10  ;;  %v134_v33 = vsel %vm614_vm9, %v575_v44, %v130_v11  ;;  %415 = vrsqrt.f32 %v598_v17  ;;  %v269_v35 = vmul.f32 8.0, %v154_v23 }
  0x92   :  { %v158_v28 = vmul.f32 0.5, %v157_v15  ;;  %v117_v29 = vmul.f32 %v412_v9, %v116_v16  ;;  %vm122_vm14 = vweird.f32 %v412_v9  ;;  %v633_v45 = vmax.f32 %v70_v62, 1e-24 }
  0x93   :  { %v138_v32 = vmul.f32 0.5, %v137_v22  ;;  %v114_v49 = vsel %vm629_vm13, %v579_v47, %v110_v27  ;;  %v267_v37 = vmul.f32 8.0, %v134_v33  ;;  %vm123_vm1 = vmor %vm121_vm12, %vm122_vm14  ;;  %vm191_vm2 = vweird.f32 %v589_v61 }
  0x94   :  { %v159_v34 = vsub.f32 1.5, %v158_v28  ;;  %v118_v36 = vmul.f32 0.5, %v117_v29  ;;  %v80_v38 = vpop.xlane.xlu2 %79  ;;  %v78_v44 = vpop.xlane.xlu1 %77  ;;  %417 = vrsqrt.f32 %v633_v45  ;;  %v265_v58 = vmul.f32 8.0, %v114_v49 }
  0x95   :  { %v623_v39 = vpop.eup %413  ;;  %v139_v43 = vsub.f32 1.5, %v138_v32  ;;  %v76_v48 = vpop.xlane.xlu0 %75  ;;  %v644_v54 = vmax.f32 %v80_v38, 1e-24  ;;  %v650_v57 = vmax.f32 %v78_v44, 1e-24  ;;  %vm181_vm4 = vweird.f32 %v598_v17 }
  0x96   :  { %v160_v50 = vmul.f32 %v408_v59, %v159_v34  ;;  %v119_v51 = vsub.f32 1.5, %v118_v36  ;;  %v186_v52 = vmul.f32 %v623_v39, %v589_v61  ;;  %v662_v15 = vmax.f32 %v76_v48, 1e-24 }
  0x97   :  { %v140_v53 = vmul.f32 %v410_v63, %v139_v43  ;;  %419 = vrsqrt.f32 %v644_v54  ;;  %v416_v41 = vpop.eup %415  ;;  %vm192_vm3 = vweird.f32 %v623_v39  ;;  %vm171_vm6 = vweird.f32 %v633_v45 }
  0x98   :  { %v164_v55 = vsel %vm163_vm15, %v408_v59, %v160_v50  ;;  %v120_v47 = vmul.f32 %v412_v9, %v119_v51  ;;  %v187_v56 = vmul.f32 %v623_v39, %v186_v52  ;;  %v285_v59 = vmul.f32 %v269_v35, %v504_v0  ;;  %vm708_vm14 = vmor %vm191_vm2, %vm192_vm3 }
  0x99   :  { %v270_v60 = vmul.f32 8.0, %v164_v55  ;;  %v144_v62 = vsel %vm143_vm0, %v410_v63, %v140_v53  ;;  %421 = vrsqrt.f32 %v650_v57  ;;  %v176_v11 = vmul.f32 %v416_v41, %v598_v17 }
  0x9a   :  { %v268_v3 = vmul.f32 8.0, %v144_v62  ;;  %v124_v42 = vsel %vm123_vm1, %v412_v9, %v120_v47  ;;  %v188_v10 = vmul.f32 0.5, %v187_v56  ;;  %v283_v63 = vmul.f32 %v267_v37, %v506_v1  ;;  %v664_v21 = vpop.eup %417 }
  0x9b   :  { %v286_v4 = vmul.f32 %v270_v60, %v516_v6  ;;  %v266_v5 = vmul.f32 8.0, %v124_v42  ;;  %v281_v0 = vmul.f32 %v265_v58, %v508_v2  ;;  %v177_v23 = vmul.f32 %v416_v41, %v176_v11 }
  0x9c   :  { %v284_v46 = vmul.f32 %v268_v3, %v518_v7  ;;  %v86_v16 = vpop.xlane.xlu2 %85  ;;  %v166_v1 = vmul.f32 %v664_v21, %v633_v45  ;;  %v189_v31 = vsub.f32 1.5, %v188_v10  ;;  %423 = vrsqrt.f32 %v662_v15  ;;  %v84_v34 = vpop.xlane.xlu1 %83 }
  0x9d   :  { %v361_v9 = vpack.c.bf16 %v286_v4, %v285_v59  ;;  %v282_v22 = vmul.f32 %v266_v5, %v520_v8  ;;  %v82_v6 = vpop.xlane.xlu0 %81  ;;  %v671_v28 = vmax.f32 %v86_v16, 1e-24  ;;  %v673_v7 = vpop.eup %419  ;;  %v178_v32 = vmul.f32 0.5, %v177_v23 }
  0x9e   :  { %v356_v27 = vpack.c.bf16 %v284_v46, %v283_v63  ;;  %v167_v8 = vmul.f32 %v664_v21, %v166_v1  ;;  %v216_v33 = vmul.f32 %v673_v7, %v644_v54  ;;  %vm182_vm5 = vweird.f32 %v416_v41 }
  0x9f   :  { %389 = vst [vmem:[#allocation5 + $0x10] sm:$0xff] %v361_v9   ;;  %v351_v29 = vpack.c.bf16 %v282_v22, %v281_v0  ;;  %v422_v2 = vpop.eup %421  ;;  %v179_v36 = vsub.f32 1.5, %v178_v32  ;;  %vm221_vm7 = vweird.f32 %v644_v54  ;;  %425 = vrsqrt.f32 %v671_v28  ;;  %vm183_vm8 = vmor %vm181_vm4, %vm182_vm5 }
  0xa0   :  { %388 = vst [vmem:[#allocation5 + $0x8] sm:$0xff] %v356_v27   ;;  %v206_v38 = vmul.f32 %v422_v2, %v650_v57  ;;  %v168_v35 = vmul.f32 0.5, %v167_v8  ;;  %v217_v40 = vmul.f32 %v673_v7, %v216_v33  ;;  %v190_v43 = vmul.f32 %v623_v39, %v189_v31 }
  0xa1   :  { %352 = vst [vmem:[#allocation5] sm:$0xff] %v351_v29   ;;  %v180_v44 = vmul.f32 %v416_v41, %v179_v36  ;;  %v687_v49 = vmax.f32 %v84_v34, 1e-24  ;;  %vm172_vm9 = vweird.f32 %v664_v21  ;;  %v692_v52 = vmax.f32 %v82_v6, 1e-24 }
  0xa2   :  { %v207_v48 = vmul.f32 %v422_v2, %v206_v38  ;;  %v169_v50 = vsub.f32 1.5, %v168_v35  ;;  %v218_v51 = vmul.f32 0.5, %v217_v40  ;;  %v424_v37 = vpop.eup %423  ;;  %vm222_vm10 = vweird.f32 %v673_v7  ;;  %vm173_vm11 = vmor %vm171_vm6, %vm172_vm9 }
  0xa3   :  { %v184_v53 = vsel %vm183_vm8, %v416_v41, %v180_v44  ;;  %427 = vrsqrt.f32 %v687_v49  ;;  %v196_v17 = vmul.f32 %v424_v37, %v662_v15  ;;  %vm211_vm12 = vweird.f32 %v650_v57  ;;  %vm223_vm0 = vmor %vm221_vm7, %vm222_vm10 }
  0xa4   :  { %v208_v55 = vmul.f32 0.5, %v207_v48  ;;  %v272_v47 = vmul.f32 8.0, %v184_v53  ;;  %v170_v56 = vmul.f32 %v664_v21, %v169_v50  ;;  %v219_v58 = vsub.f32 1.5, %v218_v51 }
  0xa5   :  { %vm212_vm13 = vweird.f32 %v422_v2  ;;  %429 = vrsqrt.f32 %v692_v52  ;;  %v88_v62 = vpop.xlane.xlu0 %87  ;;  %v702_v41 = vpop.eup %425  ;;  %v197_v42 = vmul.f32 %v424_v37, %v196_v17  ;;  %vm201_vm15 = vweird.f32 %v662_v15 }
  0xa6   :  { %v209_v60 = vsub.f32 1.5, %v208_v55  ;;  %v174_v45 = vsel %vm173_vm11, %v664_v21, %v170_v56  ;;  %v220_v3 = vmul.f32 %v673_v7, %v219_v58  ;;  %v288_v4 = vmul.f32 %v272_v47, %v530_v13  ;;  %vm213_vm1 = vmor %vm211_vm12, %vm212_vm13 }
  0xa7   :  { %v271_v5 = vmul.f32 8.0, %v174_v45  ;;  %v246_v10 = vmul.f32 %v702_v41, %v671_v28  ;;  %v194_v11 = vsel %vm708_vm14, %v623_v39, %v190_v43  ;;  %v198_v13 = vmul.f32 0.5, %v197_v42 }
  0xa8   :  { %v210_v61 = vmul.f32 %v422_v2, %v209_v60  ;;  %v224_v63 = vsel %vm223_vm0, %v673_v7, %v220_v3  ;;  %v729_v46 = vmax.f32 %v88_v62, 1e-24  ;;  %vm202_vm2 = vweird.f32 %v424_v37 }
  0xa9   :  { %v428_v16 = vpop.eup %427  ;;  %v287_v54 = vmul.f32 %v271_v5, %v532_v14  ;;  %v276_v21 = vmul.f32 8.0, %v224_v63  ;;  %v247_v9 = vmul.f32 %v702_v41, %v246_v10  ;;  %v199_v23 = vsub.f32 1.5, %v198_v13  ;;  %vm203_vm3 = vmor %vm201_vm15, %vm202_vm2 }
  0xaa   :  { %v214_v0 = vsel %vm213_vm1, %v422_v2, %v210_v61  ;;  %v236_v39 = vmul.f32 %v428_v16, %v687_v49  ;;  %431 = vrsqrt.f32 %v729_v46  ;;  %v273_v32 = vmul.f32 8.0, %v194_v11 }
  0xab   :  { %v275_v22 = vmul.f32 8.0, %v214_v0  ;;  %v430_v6 = vpop.eup %429  ;;  %v366_v27 = vpack.c.bf16 %v288_v4, %v287_v54  ;;  %v292_v57 = vmul.f32 %v276_v21, %v540_v18  ;;  %v248_v1 = vmul.f32 0.5, %v247_v9 }
  0xac   :  { %v200_v29 = vmul.f32 %v424_v37, %v199_v23  ;;  %v237_v14 = vmul.f32 %v428_v16, %v236_v39  ;;  %v226_v31 = vmul.f32 %v430_v6, %v692_v52  ;;  %vm241_vm4 = vweird.f32 %v687_v49 }
  0xad   :  { %v291_v7 = vmul.f32 %v275_v22, %v542_v19  ;;  %390 = vst [vmem:[#allocation5 + $0x18] sm:$0xff] %v366_v27   ;;  %v249_v18 = vsub.f32 1.5, %v248_v1  ;;  %vm242_vm5 = vweird.f32 %v428_v16  ;;  %v289_v40 = vmul.f32 %v273_v32, %v528_v12 }
  0xae   :  { %v204_v8 = vsel %vm203_vm3, %v424_v37, %v200_v29  ;;  %v238_v33 = vmul.f32 0.5, %v237_v14  ;;  %v227_v34 = vmul.f32 %v430_v6, %v226_v31  ;;  %vm232_vm6 = vweird.f32 %v430_v6  ;;  %vm243_vm9 = vmor %vm241_vm4, %vm242_vm5 }
  0xaf   :  { %v376_v2 = vpack.c.bf16 %v292_v57, %v291_v7  ;;  %v274_v36 = vmul.f32 8.0, %v204_v8  ;;  %vm251_vm7 = vweird.f32 %v671_v28  ;;  %vm252_vm8 = vweird.f32 %v702_v41 }
  0xb0   :  { %v239_v38 = vsub.f32 1.5, %v238_v33  ;;  %v228_v19 = vmul.f32 0.5, %v227_v34  ;;  %v432_v35 = vpop.eup %431  ;;  %vm231_vm10 = vweird.f32 %v692_v52  ;;  %v250_v51 = vmul.f32 %v702_v41, %v249_v18  ;;  %vm253_vm12 = vmor %vm251_vm7, %vm252_vm8 }
  0xb1   :  { %392 = vst [vmem:[#allocation5 + $0x28] sm:$0xff] %v376_v2   ;;  %v290_v43 = vmul.f32 %v274_v36, %v544_v20  ;;  %v256_v48 = vmul.f32 %v432_v35, %v729_v46  ;;  %vm233_vm11 = vmor %vm231_vm10, %vm232_vm6  ;;  %vm262_vm13 = vweird.f32 %v432_v35  ;;  %vm261_vm14 = vweird.f32 %v729_v46 }
  0xb2   :  { %v240_v44 = vmul.f32 %v428_v16, %v239_v38  ;;  %v229_v15 = vsub.f32 1.5, %v228_v19  ;;  %v254_v58 = vsel %vm253_vm12, %v702_v41, %v250_v51  ;;  %vm263_vm15 = vmor %vm261_vm14, %vm262_vm13 }
  0xb3   :  { %v371_v50 = vpack.c.bf16 %v290_v43, %v289_v40  ;;  %v257_v20 = vmul.f32 %v432_v35, %v256_v48  ;;  %v279_v60 = vmul.f32 8.0, %v254_v58 }
  0xb4   :  { %v244_v12 = vsel %vm243_vm9, %v428_v16, %v240_v44  ;;  %v230_v37 = vmul.f32 %v430_v6, %v229_v15 }
  0xb5   :  { %391 = vst [vmem:[#allocation5 + $0x20] sm:$0xff] %v371_v50   ;;  %v278_v53 = vmul.f32 8.0, %v244_v12  ;;  %v258_v47 = vmul.f32 0.5, %v257_v20 }
  0xb6   :  { %v234_v55 = vsel %vm233_vm11, %v430_v6, %v230_v37 }
  0xb7   :  { %v294_v28 = vmul.f32 %v278_v53, %v554_v25  ;;  %v277_v56 = vmul.f32 8.0, %v234_v55  ;;  %v259_v49 = vsub.f32 1.5, %v258_v47  ;;  %v295_v25 = vmul.f32 %v279_v60, %v552_v24 }
  0xb9   :  { %v293_v52 = vmul.f32 %v277_v56, %v556_v26  ;;  %v260_v17 = vmul.f32 %v432_v35, %v259_v49 }
  0xbb   :  { %v381_v62 = vpack.c.bf16 %v294_v28, %v293_v52  ;;  %v264_v59 = vsel %vm263_vm15, %v432_v35, %v260_v17 }
  0xbc   :  { %v280_v45 = vmul.f32 8.0, %v264_v59 }
  0xbd   :  { %393 = vst [vmem:[#allocation5 + $0x30] sm:$0xff] %v381_v62  }
  0xbe   :  { %v296_v41 = vmul.f32 %v280_v45, %v564_v30 }
  0xc0   :  { %v386_v26 = vpack.c.bf16 %v296_v41, %v295_v25 }
  0xc2   :  { %394 = vst [vmem:[#allocation5 + $0x38] sm:$0xff] %v386_v26  }
  0xc3   :  { %341 = dma.vmem_to_hbm [thread:$0]  %s334_s13, 1024, %s336_s16, [#allocation4], %s489_s17, %s489_s17, %s490_s18  }
  0xc4   :  { %483 = dma.done.wait [#allocation4], 1024  }
  0xc5   :  { %484 = vsyncadd [#allocation4], 4294966272 }
  0xc6   :  { %346 = vsyncpa [#allocation3], 1 }
  0xc7   :  { %347 = vsyncpa [#allocation4], 1 }

</bundles_post_ra>
